<compile_context>
chip_gen: v7x
topology: tpu7x:2x2x1
jax: 0.10.0
libtpu: 0.0.40
codegen_flags: <defaults>
</compile_context>

<pallas_src>
import functools
import math

import jax
import jax.numpy as jnp
from jax.experimental import pallas as pl
from jax.experimental.pallas import tpu as pltpu


def _cdiv(a, b):
    return -(-a // b)


def _round_up(x, m):
    return _cdiv(x, m) * m


def _vmem_capacity_bytes():
    try:
        return int(pltpu.get_tpu_info().vmem_capacity_bytes)
    except Exception:
        return 64 * 1024 * 1024  # conservative default (v7x per-TensorCore)


def _device_kind():
    try:
        return jax.devices()[0].device_kind.lower()
    except Exception:
        return ""


def _mxu_k_chunk():
    kind = _device_kind()
    for old in ("v2", "v3", "v4", "v5"):
        if old in kind:
            return 128
    return 256  # v6e / v7x


def _tensorcores_per_chip():
    return 2 if "v7" in _device_kind() else 1


# --------------------------------------------------------------------------
# Kernels
# --------------------------------------------------------------------------
def _attn_tail_kernel_folded(qp_ref, kt_ref, w1e_ref, b1_ref, w2_ref, b2_ref,
                             out_ref, *, num_heads):
    # qp_ref : (1, TN, C)   f32 q projection tile
    # kt_ref : (1, C, TL)   f32 transposed k projection tile (lane-dense in L)
    # w1e_ref: (H, C)       scale * repeat(W1, head_dim) — small VMEM table
    # b1_ref : (H,)  w2_ref: (H,)  b2_ref: (1,)   — SMEM scalars
    # out_ref: (1, TN, TL)
    qp = qp_ref[0]                                   # (TN, C)
    kt = kt_ref[0]                                   # (C, TL)
    s = []
    for h in range(num_heads):
        qf_h = qp * w1e_ref[h:h + 1, :]              # (TN, C) broadcast-mul
        s.append(jnp.dot(qf_h, kt, preferred_element_type=jnp.float32))
    res = b2_ref[0]
    for h in range(num_heads):
        res = res + w2_ref[h] * jnp.maximum(s[h] + b1_ref[h], 0.0)
    out_ref[0] = jnp.maximum(res, 0.0).astype(out_ref.dtype)


def _attn_tail_kernel_unfolded(qp_ref, kt_ref, w1s_ref, b1_ref, w2_ref, b2_ref,
                               out_ref, *, num_heads, head_dim):
    # Per-head K=head_dim matmuls; scale*W1 mixing done on the VPU from SMEM.
    # w1s_ref: (H*H,) flat scale*W1 in SMEM.
    attn = []
    for h in range(num_heads):
        q_h = qp_ref[0, :, h * head_dim:(h + 1) * head_dim]   # (TN, hd)
        k_h = kt_ref[0, h * head_dim:(h + 1) * head_dim, :]   # (hd, TL)
        attn.append(jnp.dot(q_h, k_h, preferred_element_type=jnp.float32))
    res = b2_ref[0]
    for h in range(num_heads):
        s_h = None
        for hp in range(num_heads):
            t = w1s_ref[h * num_heads + hp] * attn[hp]
            s_h = t if s_h is None else s_h + t
        res = res + w2_ref[h] * jnp.maximum(s_h + b1_ref[h], 0.0)
    out_ref[0] = jnp.maximum(res, 0.0).astype(out_ref.dtype)


# --------------------------------------------------------------------------
# Wrapper
# --------------------------------------------------------------------------
def attention_tail(query, key, params, *, num_heads=2, tn=None, tl=None,
                   force_unfold=False):
    """query: (B, N, C), key: (B, L, C). Returns mask: (B, N, L, 1) float32."""
    B, N, C = query.shape
    _, L, _ = key.shape
    assert C % num_heads == 0, "num_heads must divide dim"
    head_dim = C // num_heads
    scale = head_dim ** (-0.5)

    # force_fp32 on (query, key): projections run in f32, hoisted to XLA so
    # they are computed exactly once (not per output tile).
    q32 = query.astype(jnp.float32)
    k32 = key.astype(jnp.float32)
    wq = params["wq"].astype(jnp.float32)                      # (C, C) (out, in)
    wk = params["wk"].astype(jnp.float32)                      # (C, C)
    w1 = params["w1"].astype(jnp.float32)                      # (H, H)
    b1 = params["b1"].astype(jnp.float32)                      # (H,)
    w2 = params["w2"].astype(jnp.float32).reshape(num_heads)   # (H,)
    b2 = params["b2"].astype(jnp.float32)                      # (1,)

    qp = jnp.einsum("bnc,dc->bnd", q32, wq)                    # (B, N, C)
    kt = jnp.einsum("blc,dc->bdl", k32, wk)                    # (B, C, L), lane-dense L

    mxu_k = _mxu_k_chunk()
    vmem_cap = _vmem_capacity_bytes()
    budget = (vmem_cap * 3) // 4                               # headroom below cap

    # Fold scale*W1 into the q side only while it does not increase the MXU
    # pass count (ceil(C/chunk) vs ceil(head_dim/chunk)).
    use_fold = (not force_unfold) and (_cdiv(C, mxu_k) <= _cdiv(head_dim, mxu_k))

    # --- tile selection: minimize padding, stay under the VMEM budget ------
    big_vmem = vmem_cap >= 100 * 1024 * 1024                   # v5e/v6e 128 MiB
    tl_cap = 1024 if big_vmem else 512
    tn_cap = 512 if (big_vmem and N >= 1024) else 256
    if tn is None:
        tn = _round_up(_cdiv(N, _cdiv(N, tn_cap)), 8)
    if tl is None:
        tl = _round_up(_cdiv(L, _cdiv(L, tl_cap)), 128)

    def footprint(tn_, tl_):
        qp_blk = tn_ * C * 4
        kt_blk = C * tl_ * 4
        out_blk = tn_ * tl_ * 4
        temps = 3 * tn_ * tl_ * 4                              # f32 s_h / acc temporaries
        small = num_heads * C * 4
        return 2 * (qp_blk + kt_blk + out_blk + small) + temps

    while footprint(tn, tl) > budget:
        if tl > 128 and (tl >= tn or tn <= 8):
            tl = _round_up(tl // 2, 128)
        elif tn > 8:
            tn = _round_up(tn // 2, 8)
        else:
            break

    # v7x has 2 TensorCores per chip: guarantee >= 2 grid steps.
    if _tensorcores_per_chip() >= 2 and B * _cdiv(N, tn) * _cdiv(L, tl) < 2:
        if L > 128:
            tl = _round_up(_cdiv(L, 2), 128)
        elif N > 8:
            tn = _round_up(_cdiv(N, 2), 8)

    n_tiles = _cdiv(N, tn)
    l_tiles = _cdiv(L, tl)
    n_pad = n_tiles * tn
    l_pad = l_tiles * tl
    if n_pad != N:
        qp = jnp.pad(qp, ((0, 0), (0, n_pad - N), (0, 0)))
    if l_pad != L:
        # Zero-padded L columns produce relu(b1)·w2+b2 garbage; they are
        # sliced off below — keep the slice if you keep the padding.
        kt = jnp.pad(kt, ((0, 0), (0, 0), (0, l_pad - L)))

    grid = (B, n_tiles, l_tiles)

    if use_fold:
        w1e = scale * jnp.repeat(w1, head_dim, axis=1)         # (H, C) tiny table
        kernel = functools.partial(_attn_tail_kernel_folded, num_heads=num_heads)
        small_in = w1e
        small_spec = pl.BlockSpec((num_heads, C), lambda b, i, j: (0, 0))
    else:
        w1s = (scale * w1).reshape(num_heads * num_heads)      # SMEM scalars
        kernel = functools.partial(_attn_tail_kernel_unfolded,
                                   num_heads=num_heads, head_dim=head_dim)
        small_in = w1s
        small_spec = pl.BlockSpec(memory_space=pltpu.MemorySpace.SMEM)

    out = pl.pallas_call(
        kernel,
        out_shape=jax.ShapeDtypeStruct((B, n_pad, l_pad), jnp.float32),
        grid=grid,
        in_specs=[
            pl.BlockSpec((1, tn, C), lambda b, i, j: (b, i, 0)),     # qp
            pl.BlockSpec((1, C, tl), lambda b, i, j: (b, 0, j)),     # kt
            small_spec,                                              # w1e / w1s
            pl.BlockSpec(memory_space=pltpu.MemorySpace.SMEM),       # b1
            pl.BlockSpec(memory_space=pltpu.MemorySpace.SMEM),       # w2
            pl.BlockSpec(memory_space=pltpu.MemorySpace.SMEM),       # b2
        ],
        out_specs=pl.BlockSpec((1, tn, tl), lambda b, i, j: (b, i, j)),
        compiler_params=pltpu.CompilerParams(
            dimension_semantics=("parallel", "parallel", "parallel"),
            vmem_limit_bytes=int(budget),
        ),
    )(qp, kt, small_in, b1, w2, b2)

    if n_pad != N or l_pad != L:
        out = out[:, :N, :L]
    return out.reshape(B, N, L, 1)


# --------------------------------------------------------------------------
# Parameter init + pure-JAX reference
# --------------------------------------------------------------------------
def _xavier_uniform(key, shape, dtype=jnp.float32):
    fan_out, fan_in = shape[0], shape[1]
    bound = math.sqrt(6.0 / (fan_in + fan_out))
    return jax.random.uniform(key, shape, dtype, minval=-bound, maxval=bound)


def init_params(rng, dim, num_heads):
    k = jax.random.split(rng, 6)
    # Xavier-uniform on all >1-D params (matches _reset_parameters); small
    # deterministic uniform biases (PyTorch Linear default, not reset).
    return {
        "wq": _xavier_uniform(k[0], (dim, dim)),
        "wk": _xavier_uniform(k[1], (dim, dim)),
        "w1": _xavier_uniform(k[2], (num_heads, num_heads)),
        "b1": jax.random.uniform(k[3], (num_heads,), jnp.float32, -0.5, 0.5),
        "w2": _xavier_uniform(k[4], (1, num_heads)),
        "b2": jax.random.uniform(k[5], (1,), jnp.float32, -0.5, 0.5),
    }


def attention_tail_reference(query, key, params, *, num_heads=2):
    """Pure-JAX reference mirroring the PyTorch forward."""
    B, N, C = query.shape
    _, L, _ = key.shape
    hd = C // num_heads
    scale = hd ** (-0.5)
    query = query.astype(jnp.float32)
    key = key.astype(jnp.float32)
    q = (query @ params["wq"].T).reshape(B, N, num_heads, hd).transpose(0, 2, 1, 3)
    k = (key @ params["wk"].T).reshape(B, L, num_heads, hd).transpose(0, 2, 1, 3)
    attn = jnp.einsum("bhnd,bhld->bhnl", q, k) * scale
    attn = attn.transpose(0, 2, 3, 1)                          # (B, N, L, H)
    new_feats = jax.nn.relu(attn @ params["w1"].T + params["b1"])
    mask = jax.nn.relu(new_feats @ params["w2"].T + params["b2"])
    return mask                                                # (B, N, L, 1)


if __name__ == "__main__":
    B, N, L, C, H = 2, 16, 64, 32, 2
    rng = jax.random.PRNGKey(0)
    kq, kk, kp = jax.random.split(rng, 3)

    query = jax.random.normal(kq, (B, N, C), jnp.float32)
    key = jax.random.normal(kk, (B, L, C), jnp.float32)
    params = init_params(kp, C, H)

    ref = attention_tail_reference(query, key, params, num_heads=H)

    # Default (folded scale*W1) path.
    mask = attention_tail(query, key, params, num_heads=H)
    mask = jax.block_until_ready(mask)
    assert mask.shape == (B, N, L, 1)
    assert jnp.allclose(mask, ref, atol=1e-4, rtol=1e-4), "folded path mismatch"

    # Exercise the unfolded (per-head K=head_dim) path used when C exceeds
    # the MXU K-chunk on the current chip.
    mask2 = attention_tail(query, key, params, num_heads=H, force_unfold=True)
    mask2 = jax.block_until_ready(mask2)
    assert jnp.allclose(mask2, ref, atol=1e-4, rtol=1e-4), "unfolded path mismatch"

    print("KERNEL_OK")
</pallas_src>

<mosaic_0001>
module attributes {stable_mosaic.version = 11 : i64} {
  func.func @_attn_tail_kernel_folded(%arg0: i32, %arg1: i32, %arg2: i32, %arg3: memref<1x16x32xf32, #tpu.memory_space<vmem>>, %arg4: memref<1x32x128xf32, #tpu.memory_space<vmem>>, %arg5: memref<2x32xf32, #tpu.memory_space<vmem>>, %arg6: memref<2xf32, #tpu.memory_space<smem>>, %arg7: memref<2xf32, #tpu.memory_space<smem>>, %arg8: memref<1xf32, #tpu.memory_space<smem>>, %arg9: memref<1x16x128xf32, #tpu.memory_space<vmem>>) attributes {dimension_semantics = [#tpu.dimension_semantics<parallel>, #tpu.dimension_semantics<parallel>, #tpu.dimension_semantics<parallel>], iteration_bounds = array<i64: 2, 1, 1>, scalar_prefetch = 0 : i64, scratch_operands = 0 : i64, tpu.core_type = #tpu.core_type<tc>, window_params = [{transform_indices = @transform_0, window_bounds = array<i64: 1, 16, 32>}, {transform_indices = @transform_1, window_bounds = array<i64: 1, 32, 128>}, {pipeline_mode = #tpu.pipeline_mode<synchronous>, transform_indices = @transform_2, window_bounds = array<i64: 2, 32>}, {transform_indices = @transform_3, window_bounds = array<i64: 2>}, {transform_indices = @transform_4, window_bounds = array<i64: 2>}, {transform_indices = @transform_5, window_bounds = array<i64: 1>}, {transform_indices = @transform_6, window_bounds = array<i64: 1, 16, 128>}]} {
    %c0 = arith.constant 0 : index
    %c0_0 = arith.constant 0 : index
    %c0_1 = arith.constant 0 : index
    %0 = vector.load %arg3[%c0, %c0_0, %c0_1] : memref<1x16x32xf32, #tpu.memory_space<vmem>>, vector<1x16x32xf32>
    %1 = vector.shape_cast %0 : vector<1x16x32xf32> to vector<16x32xf32>
    %c0_2 = arith.constant 0 : index
    %c0_3 = arith.constant 0 : index
    %c0_4 = arith.constant 0 : index
    %2 = vector.load %arg4[%c0_2, %c0_3, %c0_4] : memref<1x32x128xf32, #tpu.memory_space<vmem>>, vector<1x32x128xf32>
    %3 = vector.shape_cast %2 : vector<1x32x128xf32> to vector<32x128xf32>
    %c0_5 = arith.constant 0 : index
    %c0_6 = arith.constant 0 : index
    %4 = vector.load %arg5[%c0_5, %c0_6] : memref<2x32xf32, #tpu.memory_space<vmem>>, vector<1x32xf32>
    %5 = vector.broadcast %4 : vector<1x32xf32> to vector<16x32xf32>
    %6 = arith.mulf %1, %5 : vector<16x32xf32>
    %cst = arith.constant dense<0.000000e+00> : vector<16x128xf32>
    %7 = tpu.matmul %6, %3, %cst {dimension_numbers = #tpu.dot_dimension_numbers<[1], [0], [0], [1], [0, 0, 1, 1], [], []>} : vector<16x32xf32>, vector<32x128xf32>, vector<16x128xf32> -> vector<16x128xf32>
    %c1 = arith.constant 1 : index
    %c0_7 = arith.constant 0 : index
    %8 = vector.load %arg5[%c1, %c0_7] : memref<2x32xf32, #tpu.memory_space<vmem>>, vector<1x32xf32>
    %9 = vector.broadcast %8 : vector<1x32xf32> to vector<16x32xf32>
    %10 = arith.mulf %1, %9 : vector<16x32xf32>
    %cst_8 = arith.constant dense<0.000000e+00> : vector<16x128xf32>
    %11 = tpu.matmul %10, %3, %cst_8 {dimension_numbers = #tpu.dot_dimension_numbers<[1], [0], [0], [1], [0, 0, 1, 1], [], []>} : vector<16x32xf32>, vector<32x128xf32>, vector<16x128xf32> -> vector<16x128xf32>
    %c0_9 = arith.constant 0 : index
    %12 = memref.load %arg8[%c0_9] : memref<1xf32, #tpu.memory_space<smem>>
    %c0_10 = arith.constant 0 : index
    %13 = memref.load %arg7[%c0_10] : memref<2xf32, #tpu.memory_space<smem>>
    %c0_11 = arith.constant 0 : index
    %14 = memref.load %arg6[%c0_11] : memref<2xf32, #tpu.memory_space<smem>>
    %15 = vector.broadcast %14 : f32 to vector<16x128xf32>
    %16 = arith.addf %7, %15 : vector<16x128xf32>
    %cst_12 = arith.constant 0.000000e+00 : f32
    %17 = vector.broadcast %cst_12 : f32 to vector<16x128xf32>
    %18 = arith.maximumf %16, %17 : vector<16x128xf32>
    %19 = vector.broadcast %13 : f32 to vector<16x128xf32>
    %20 = arith.mulf %19, %18 : vector<16x128xf32>
    %21 = vector.broadcast %12 : f32 to vector<16x128xf32>
    %22 = arith.addf %21, %20 : vector<16x128xf32>
    %c1_13 = arith.constant 1 : index
    %23 = memref.load %arg7[%c1_13] : memref<2xf32, #tpu.memory_space<smem>>
    %c1_14 = arith.constant 1 : index
    %24 = memref.load %arg6[%c1_14] : memref<2xf32, #tpu.memory_space<smem>>
    %25 = vector.broadcast %24 : f32 to vector<16x128xf32>
    %26 = arith.addf %11, %25 : vector<16x128xf32>
    %cst_15 = arith.constant 0.000000e+00 : f32
    %27 = vector.broadcast %cst_15 : f32 to vector<16x128xf32>
    %28 = arith.maximumf %26, %27 : vector<16x128xf32>
    %29 = vector.broadcast %23 : f32 to vector<16x128xf32>
    %30 = arith.mulf %29, %28 : vector<16x128xf32>
    %31 = arith.addf %22, %30 : vector<16x128xf32>
    %cst_16 = arith.constant 0.000000e+00 : f32
    %32 = vector.broadcast %cst_16 : f32 to vector<16x128xf32>
    %33 = arith.maximumf %31, %32 : vector<16x128xf32>
    %c0_17 = arith.constant 0 : index
    %c0_18 = arith.constant 0 : index
    %c0_19 = arith.constant 0 : index
    %34 = vector.load %arg9[%c0_17, %c0_18, %c0_19] : memref<1x16x128xf32, #tpu.memory_space<vmem>>, vector<1x16x128xf32>
    %35 = vector.shape_cast %34 : vector<1x16x128xf32> to vector<16x128xf32>
    %36 = vector.shape_cast %33 : vector<16x128xf32> to vector<1x16x128xf32>
    tpu.vector_store %arg9[%c0_17, %c0_18, %c0_19], %36 {strides = array<i32>} : memref<1x16x128xf32, #tpu.memory_space<vmem>>, vector<1x16x128xf32>,
    return
  }
  func.func @transform_0(%arg0: i32, %arg1: i32, %arg2: i32) -> (i32, i32, i32) {
    %c0_i32 = arith.constant 0 : i32
    %c0_i32_0 = arith.constant 0 : i32
    return %arg0, %arg1, %c0_i32 : i32, i32, i32
  }
  func.func @transform_1(%arg0: i32, %arg1: i32, %arg2: i32) -> (i32, i32, i32) {
    %c0_i32 = arith.constant 0 : i32
    %c0_i32_0 = arith.constant 0 : i32
    return %arg0, %c0_i32, %arg2 : i32, i32, i32
  }
  func.func @transform_2(%arg0: i32, %arg1: i32, %arg2: i32) -> (i32, i32) {
    %c0_i32 = arith.constant 0 : i32
    %c0_i32_0 = arith.constant 0 : i32
    %c0_i32_1 = arith.constant 0 : i32
    return %c0_i32, %c0_i32_0 : i32, i32
  }
  func.func @transform_3(%arg0: i32, %arg1: i32, %arg2: i32) -> i32 {
    %c0_i32 = arith.constant 0 : i32
    %c0_i32_0 = arith.constant 0 : i32
    return %c0_i32 : i32
  }
  func.func @transform_4(%arg0: i32, %arg1: i32, %arg2: i32) -> i32 {
    %c0_i32 = arith.constant 0 : i32
    %c0_i32_0 = arith.constant 0 : i32
    return %c0_i32 : i32
  }
  func.func @transform_5(%arg0: i32, %arg1: i32, %arg2: i32) -> i32 {
    %c0_i32 = arith.constant 0 : i32
    %c0_i32_0 = arith.constant 0 : i32
    return %c0_i32 : i32
  }
  func.func @transform_6(%arg0: i32, %arg1: i32, %arg2: i32) -> (i32, i32, i32) {
    %c0_i32 = arith.constant 0 : i32
    return %arg0, %arg1, %arg2 : i32, i32, i32
  }
}

</mosaic_0001>

<bundles_post_ra>
// kernel: tpu_custom_call.1
= control target key start
LH: loop header
LB: loop body
LE: loop exit
PB: predicated region body
PF: predicated region fallthrough
CT: control target
= control target key end

     0   :  { %s1418_s0 = inlined_call_operand.hbm [shape: f32[2,16,32], index: 0, kind: input, shape index: {}]   ;;  %s1419_s1 = inlined_call_operand.hbm [shape: f32[2,32,128], index: 1, kind: input, shape index: {}]   ;;  %s1420_s2 = inlined_call_operand.vmem [shape: f32[2,32], index: 2, kind: input, shape index: {}]   ;;  %s1421_s3 = inlined_call_operand.vmem [shape: f32[2], index: 3, kind: input, shape index: {}]   ;;  %s1422_s4 = inlined_call_operand.vmem [shape: f32[2], index: 4, kind: input, shape index: {}]   ;;  %s1423_s5 = inlined_call_operand.<no memory space> [shape: f32[1], index: 5, kind: input, shape index: {}]   ;;  %s1424_s6 = inlined_call_operand.hbm [shape: f32[2,16,128], index: 6, kind: output, shape index: {}]  }
   0x1   :  { %1432 = sst [smem:[#allocation19_spill]] %s1418_s0 }
   0x2   :  { %1433 = sst [smem:[#allocation20_spill]] %s1421_s3 }
   0x3   :  { %1434 = sst [smem:[#allocation21_spill]] %s1422_s4 }
   0x4   :  { %11 = sst [smem:[#allocation2]] %s1423_s5 }
   0x5   :  { %12 = vsyncpa [#allocation4], 0 }
   0x6   :  { %14 = vsyncpa [#allocation4 + $0x1], 0 }
   0x7   :  { %15 = vsyncpa [#allocation8], 0 }
   0x8   :  { %17 = vsyncpa [#allocation8 + $0x1], 0 }
   0x9   :  { %18 = vsyncpa [#allocation6], 0 }
   0xa   :  { %19 = vsyncpa [#allocation11], 0 }
   0xb   :  { %20 = vsyncpa [#allocation5], 0 }
   0xc   :  { %22 = vsyncpa [#allocation5 + $0x1], 0  ;;  %s1143_s23 = smov 0   ;;  %s1145_s24 = smov 0  }
   0xd   :  { %s1147_s25 = smov 0   ;;  %s1149_s26 = smov 0  }
   0xe   :  { %s1151_s27 = smov 0   ;;  %s1153_s28 = smov 0  }
   0xf LB: > { %s734_s5 = sadd.s32 4294967295, %s1094_s28   ;;  %s735_s29 = sadd.s32 4294967294, %s1094_s28   ;;  %s1094_s28 = sphi %s1153_s28, %s28_s28   ;;  %s1090_s27 = sphi %s1151_s27, %s1459_s27   ;;  %s1086_s26 = sphi %s1149_s26, %s1458_s26   ;;  %s1082_s25 = sphi %s1147_s25, %s1457_s25   ;;  %s1078_s24 = sphi %s1145_s24, %s1456_s24   ;;  %s1074_s23 = sphi %s1143_s23, %s1455_s23  }
  0x10   : > { %s56_s30 = sadd.s32 1, %s1082_s25  ;;  %p63_p0 = scmp.ne.s32.totalorder %s1082_s25, %s1078_s24 }
  0x11   : > { %p64_p1 = scmp.eq.s32.totalorder %s1094_s28, 0  ;;  %p69_p2 = scmp.ne.s32.totalorder %s1078_s24, %s1074_s23 }
  0x12   : > { %p1181_p3 = scmp.eq.s32.totalorder %s734_s5, 0  ;;  %p209_p4 = scmp.eq.s32.totalorder %s734_s5, 1 }
  0x13   : > { %p1185_p5 = por %p64_p1, %p63_p0  ;;  %p215_p6 = scmp.eq.s32.totalorder %s735_s29, 1 }
  0x14   : > { %s1435_s7 = scalar_select %p1181_p3, 1, 0 }
  0x15   : > { %p1191_p7 = por %p1181_p3, %p69_p2  ;;  %p1195_p8 = por %p209_p4, %p63_p0 }
  0x16   : > { %p1199_p9 = por %p215_p6, %p69_p2  ;;  %p736_p10 = scmp.ge.s32.totalorder %s1094_s28, 1 }
  0x17   : > { %s1437_s9 = scalar_select %p1191_p7, 1, 0 }
  0x18   : > { %s1438_s10 = scalar_select %p1195_p8, 1, 0 }
  0x19   : > { %s1439_s11 = scalar_select %p1199_p9, 1, 0 }
  0x1a   : > { %p222_p11 = scmp.lt.s32.totalorder %s1094_s28, 3  ;;  %s1440_s3 = sld [smem:[#allocation20_spill]] }
  0x1b   : > { %p852_p0 = scmp.lt.s32.totalorder %s1094_s28, 2  ;;  %s1442_s4 = sld [smem:[#allocation21_spill]] }
  0x1c   : > { %p1208_p12 = pnand %p736_p10, %p222_p11 }
  0x1d   : > { %p1221_p2 = pnand %p852_p0, %p1185_p5 }
  0x1e   : > { %s1441_s15 = scalar_select %p1208_p12, 1, 0 }
  0x1f   : > { %p832_p1 = pneg %p1208_p12 }
  0x20   : > { %s238_s14 = sshll.u32 %s1440_s3, 4  ;;  %s239_s14 = int_to_ptr.vmem [resolvable:$true] %s238_s14 }
  0x21   : > { %s249_s18 = sshll.u32 %s1442_s4, 4  ;;  %p1227_p4 = pnand %p832_p1, %p1181_p3  ;;  %s250_s18 = int_to_ptr.vmem [resolvable:$true] %s249_s18 }
  0x22   : > { %s1443_s19 = scalar_select %p1221_p2, 1, 0 }
  0x23   : > { %s910_s21 = scalar_lea.vmem %s239_s14, 16  ;;  %p912_p10 = pneg %p1227_p4 }
  0x24   : > { %p911_p6 = scmp.ne.s32.totalorder %s239_s14, %s910_s21  ;;  %p918_p9 = scmp.lt.s32.totalorder %s239_s14, %s239_s14 }
  0x25   : > { %p919_p8 = scmp.lt.s32.totalorder %s910_s21, %s910_s21 }
  0x26   : > { %p913_p11 = pnand %p912_p10, %p911_p6 }
  0x27   : > { %p920_p7 = por %p919_p8, %p918_p9 }
  0x28   : > { %p914_p13 = pneg %p913_p11 }
  0x2a   : > { %p921_p5 = pnand %p920_p7, %p914_p13 }
  0x2c   : > { %924 = shalt.err (!%p921_p5)
}
  0x2d   : > { %s1096_s22 = smov [#allocation9]   ;;  %s925_s5 = scalar_lea.vmem %s250_s18, 16 }
  0x2e   : > { %835 = dma.vmem_to_smem (!%p1227_p4), %s239_s14, 16, %s1096_s22, [#allocation6]  }
  0x2f   : > { %p926_p0 = scmp.ne.s32.totalorder %s250_s18, %s925_s5  ;;  %p933_p12 = scmp.lt.s32.totalorder %s250_s18, %s250_s18 }
  0x30   : > { %p934_p2 = scmp.lt.s32.totalorder %s925_s5, %s925_s5 }
  0x31   : > { %p928_p1 = pnand %p926_p0, %p912_p10 }
  0x32   : > { %p935_p6 = por %p934_p2, %p933_p12 }
  0x33   : > { %p929_p3 = pneg %p928_p1 }
  0x35   : > { %p936_p11 = pnand %p935_p6, %p929_p3 }
  0x37   : > { %939 = shalt.err (!%p936_p11)
}
  0x38   : > { %s1097_s29 = smov [#allocation10]   ;;  %s47_s8 = sadd.s32 1, %s1090_s27 }
  0x39   : > { %838 = dma.vmem_to_smem (!%p1227_p4), %s250_s18, 16, %s1097_s29, [#allocation11]  }
  0x3a   : > { %s1239_s12 = sand.u32 1, %s1082_s25   ;;  %p49_p7 = scmp.ge.s32.totalorder %s47_s8, 2 }
  0x3b   : > { %s740_s13 = sshll.u32 %s1239_s12, 4  ;;  %s765_s14 = sshll.u32 %s1090_s27, 8 }
  0x3c   : > { %s1461_s8 = smov (%p49_p7, %s47_s8), 0  ;;  %s1446_s0 = sld [smem:[#allocation19_spill]] }
  0x3d   : > { %1445 = sst [smem:[#allocation18_spill]] %s1461_s8  ;;  %s51_s18 = ssub.s32 %s1090_s27, %s1461_s8 }
  0x3e   : > { %s267_s21 = scalar_lea.vmem [#allocation3], %s740_s13  ;;  %p54_p3 = scmp.eq.s32.totalorder %s51_s18, 0 }
  0x3f   : > { %s276_s22 = sshll.u32 %s267_s21, 4  ;;  %s264_s29 = scalar_lea.sflag [#allocation4], %s1239_s12  ;;  %s1252_s22 = int_to_ptr.vmem [resolvable:$true] %s276_s22 }
  0x40   : > { %s1257_s5 = scalar_select %p54_p3, %s1082_s25, %s56_s30  }
  0x41   : > { %p1447_p9 = scmp.ne.s32.totalorder %s1443_s19, 0 }
  0x42   : > { %s1248_s20 = scalar_lea.hbm %s1446_s0, %s765_s14  ;;  %s945_s13 = scalar_lea.hbm %s1446_s0, 512 }
  0x43   : > { %s940_s3 = scalar_lea.hbm %s1248_s20, 256  ;;  %p942_p12 = pneg %p1447_p9 }
  0x44   : > { %p941_p8 = scmp.ne.s32.totalorder %s1248_s20, %s940_s3  ;;  %p946_p4 = scmp.lt.u32.totalorder %s1248_s20, %s1446_s0 }
  0x45   : > { %p947_p10 = scmp.lt.u32.totalorder %s945_s13, %s940_s3  ;;  %p949_p0 = scmp.lt.u32.totalorder %s940_s3, %s1248_s20 }
  0x46   : > { %p943_p13 = pnand %p942_p12, %p941_p8 }
  0x47   : > { %p948_p5 = por %p947_p10, %p946_p4 }
  0x48   : > { %p944_p2 = pneg %p943_p13 }
  0x49   : > { %p950_p1 = por %p949_p0, %p948_p5 }
  0x4b   : > { %p951_p6 = pnand %p950_p1, %p944_p2 }
  0x4d   : > { %954 = shalt.err (!%p951_p6)
}
  0x4e   : > { %s955_s30 = scalar_lea.vmem %s1252_s22, 256  ;;  %s1098_s21 = smov [#allocation3]  }
  0x4f   : > { %p956_p11 = scmp.ne.s32.totalorder %s1252_s22, %s955_s30  ;;  %s960_s14 = sshll.u32 %s1098_s21, 4  ;;  %s961_s14 = int_to_ptr.vmem [resolvable:$false] %s960_s14 }
  0x50   : > { %s962_s16 = scalar_lea.vmem %s961_s14, 512  ;;  %p963_p8 = scmp.lt.s32.totalorder %s1252_s22, %s961_s14 }
  0x51   : > { %p958_p7 = pnand %p956_p11, %p942_p12  ;;  %p964_p13 = scmp.lt.s32.totalorder %s962_s16, %s955_s30 }
  0x53   : > { %p959_p3 = pneg %p958_p7  ;;  %p965_p4 = por %p964_p13, %p963_p8 }
  0x55   : > { %p966_p10 = pnand %p965_p4, %p959_p3 }
  0x57   : > { %969 = shalt.err (!%p966_p10)
}
  0x58   : > { %s1099_s3 = smov 128   ;;  %s1100_s13 = smov 8  }
  0x59   : > { %842 = dma.hbm_to_vmem [thread:$0]  (!%p1447_p9), %s1248_s20, 256, %s1252_s22, %s264_s29, %s1099_s3, %s1099_s3, %s1100_s13  }
  0x5a   : > { %s743_s17 = sshll.u32 %s1239_s12, 5  ;;  %s766_s18 = sshll.u32 %s1090_s27, 9 }
  0x5b   : > { %s1295_s14 = scalar_lea.hbm %s1419_s1, %s766_s18  ;;  %s290_s16 = scalar_lea.vmem [#allocation7], %s743_s17 }
  0x5c   : > { %s298_s0 = sshll.u32 %s290_s16, 4  ;;  %s287_s4 = scalar_lea.sflag [#allocation8], %s1239_s12  ;;  %s1297_s0 = int_to_ptr.vmem [resolvable:$true] %s298_s0 }
  0x5d   : > { %s970_s8 = scalar_lea.hbm %s1295_s14, 512  ;;  %s975_s29 = scalar_lea.hbm %s1419_s1, 1024 }
  0x5e   : > { %p971_p2 = scmp.ne.s32.totalorder %s1295_s14, %s970_s8  ;;  %p976_p1 = scmp.lt.u32.totalorder %s1295_s14, %s1419_s1 }
  0x5f   : > { %p977_p6 = scmp.lt.u32.totalorder %s975_s29, %s970_s8  ;;  %p979_p7 = scmp.lt.u32.totalorder %s970_s8, %s1295_s14 }
  0x60   : > { %p973_p5 = pnand %p971_p2, %p942_p12 }
  0x61   : > { %p978_p11 = por %p977_p6, %p976_p1 }
  0x62   : > { %p974_p0 = pneg %p973_p5 }
  0x63   : > { %p980_p3 = por %p979_p7, %p978_p11 }
  0x65   : > { %p981_p8 = pnand %p980_p3, %p974_p0 }
  0x67   : > { %984 = shalt.err (!%p981_p8)
}
  0x68   : > { %s985_s17 = scalar_lea.vmem %s1297_s0, 512  ;;  %s1101_s21 = smov [#allocation7]  }
  0x69   : > { %p986_p13 = scmp.ne.s32.totalorder %s1297_s0, %s985_s17  ;;  %s990_s16 = sshll.u32 %s1101_s21, 4  ;;  %s991_s16 = int_to_ptr.vmem [resolvable:$false] %s990_s16 }
  0x6a   : > { %s992_s20 = scalar_lea.vmem %s991_s16, 1024  ;;  %p993_p2 = scmp.lt.s32.totalorder %s1297_s0, %s991_s16 }
  0x6b   : > { %p988_p4 = pnand %p986_p13, %p942_p12  ;;  %p994_p5 = scmp.lt.s32.totalorder %s992_s20, %s985_s17 }
  0x6d   : > { %p989_p10 = pneg %p988_p4  ;;  %p995_p1 = por %p994_p5, %p993_p2 }
  0x6f   : > { %p996_p6 = pnand %p995_p1, %p989_p10 }
  0x71   : > { %999 = shalt.err (!%p996_p6)
}
  0x72   : > { %845 = dma.hbm_to_vmem [thread:$0]  (!%p1447_p9), %s1295_s14, 512, %s1297_s0, %s287_s4, %s1099_s3, %s1099_s3, %s1100_s13  }
  0x73   : > { %p1448_p12 = scmp.ne.s32.totalorder %s1441_s15, 0 }
  0x74   : > { %s1331_s8 = sand.u32 (!%p1448_p12), 1, %s1078_s24   ;;  %p1449_p0 = scmp.ne.s32.totalorder (!%p1448_p12), %s1437_s9, 0 }
  0x75   : > { %310 = sbr.rel (%p1448_p12) target bundleno = 386 (0x182), region = 44  ;;  %s747_s22 = sshll.u32 (!%p1448_p12), %s1331_s8, 4 }
  0x76   : > { %s313_s19 = scalar_lea.sflag (!%p1448_p12), [#allocation4], %s1331_s8  ;;  %s316_s29 = scalar_lea.vmem (!%p1448_p12), [#allocation3], %s747_s22 }
  0x7c   : > { %1053 = dma.done.wait (%p1449_p0), %s313_s19, 256  }
  0x7d   : > { %1055 = vsyncadd (%p1449_p0), %s313_s19, 4294967040  ;;  %s748_s0 = sshll.u32 %s1331_s8, 5  ;;  %s322_s4 = scalar_lea.sflag [#allocation8], %s1331_s8 }
  0x7e   : > { %s325_s15 = scalar_lea.vmem [#allocation7], %s748_s0 }
  0x7f   : > { %1057 = dma.done.wait (%p1449_p0), %s322_s4, 512  }
  0x80   : > { %1059 = vsyncadd (%p1449_p0), %s322_s4, 4294966784  ;;  %p1450_p9 = scmp.ne.s32.totalorder %s1435_s7, 0 }
  0x82   : > { %1061 = dma.done.wait (%p1450_p9), [#allocation6], 16  }
  0x83   : > { %1063 = vsyncadd (%p1450_p9), [#allocation6], 4294967280 }
  0x84   : > { %1065 = dma.done.wait (%p1450_p9), [#allocation11], 16  }
  0x85   : > { %1067 = vsyncadd (%p1450_p9), [#allocation11], 4294967280 }
  0x86   : > { %338 = sfence }
  0x87   : > { %v372_v0 = vld [vmem:[%s325_s15] sm:$0xff]  ;;  %v373_v1 = vld [vmem:[%s325_s15 + $0x8] sm:$0xff]  ;;  %v374_v2 = vld [vmem:[%s325_s15 + $0x10] sm:$0xff]  ;;  %vm394_vm0 = vcmask 261120   ;;  %s392_s7 = sld [smem:[#allocation9]]  ;;  %s757_s14 = sld [smem:[#allocation9 + $0x1]] }
  0x88   : > { %v802_v3 = vpack.c.bf16 %v373_v1, %v372_v0  ;;  %v375_v4 = vld [vmem:[%s325_s15 + $0x18] sm:$0xff]  ;;  %v370_v5 = vld [vmem:[%s316_s29] sm:$0xff]  ;;  %s391_s18 = sld [smem:[#allocation10]]  ;;  %s756_s30 = sld [smem:[#allocation10 + $0x1]] }
  0x89   : > { %v806_v6 = vpack.c.bf16 %v375_v4, %v374_v2  ;;  %v752_v7 = vld [vmem:[%s1420_s2] ss:$0 sm:$0xff]  ;;  %v753_v8 = vld [vmem:[%s1420_s2 + $0x1] ss:$0 sm:$0xff]  ;;  %v371_v11 = vld [vmem:[%s316_s29 + $0x8] sm:$0xff]  ;;  %s390_s17 = sld [smem:[#allocation2]] }
  0x8a   : > { %803 = vmatprep.subr.bf16.mxu0 %v802_v3  ;;  %811 = vmatprep.subr.bf16.mxu1 %v802_v3  ;;  %v381_v9 = vmul.f32 %v752_v7, %v370_v5  ;;  %v388_v10 = vmul.f32 %v753_v8, %v370_v5  ;;  %v382_v12 = vmul.f32 %v752_v7, %v371_v11  ;;  %s767_s21 = sshll.u32 %s1086_s26, 8  ;;  %s367_s16 = scalar_lea.vmem [#allocation12], %s747_s22 }
  0x8b   : > { %805 = vmatpush3.bf16.msra.mxu0 %v802_v3  ;;  %813 = vmatpush3.bf16.msra.mxu1 %v802_v3  ;;  %v389_v13 = vmul.f32 %v753_v8, %v371_v11  ;;  %s596_s20 = sshll.u32 %s367_s16, 4  ;;  %s1367_s0 = scalar_lea.hbm %s1424_s6, %s767_s21  ;;  %s1369_s20 = int_to_ptr.vmem [resolvable:$true] %s596_s20 }
  0x8c   : > { %807 = vmatprep.subr.bf16.mxu0 %v806_v6  ;;  %815 = vmatprep.subr.bf16.mxu1 %v806_v6  ;;  %s580_s26 = scalar_lea.sflag [#allocation5], %s1331_s8  ;;  %s1000_s4 = scalar_lea.vmem %s1369_s20, 256 }
  0x8d   : > { %788 = vmatprep.mubr.msk.f32.mxu0 %vm394_vm0, %v381_v9  ;;  %799 = vmatprep.mubr.msk.f32.mxu1 %vm394_vm0, %v388_v10  ;;  %v393_v14 = vstv %s392_s7  ;;  %v486_v15 = vstv %s757_s14  ;;  %p1001_p11 = scmp.ne.s32.totalorder %s1369_s20, %s1000_s4  ;;  %p1451_p7 = scmp.ne.s32.totalorder %s1438_s10, 0 }
  0x8e   : > { %v478_v22 = vstv %s391_s18  ;;  %v570_v24 = vstv %s756_s30  ;;  %s1102_s22 = smov [#allocation12]  }
  0x8f   : > { %809 = vmatpush3.bf16.msra.mxu0 %v806_v6  ;;  %817 = vmatpush3.bf16.msra.mxu1 %v806_v6  ;;  %v481_v28 = vstv %s390_s17  ;;  %p1002_p3 = pnand %p1001_p11, %p1451_p7  ;;  %s1004_s15 = sshll.u32 %s1102_s22, 4  ;;  %s1005_s15 = int_to_ptr.vmem [resolvable:$false] %s1004_s15 }
  0x90   : > { %s1006_s9 = scalar_lea.vmem %s1005_s15, 512  ;;  %p1007_p13 = scmp.lt.s32.totalorder %s1369_s20, %s1005_s15 }
  0x91   : > { %p1003_p8 = pneg %p1002_p3  ;;  %p1008_p4 = scmp.lt.s32.totalorder %s1006_s9, %s1000_s4 }
  0x92   : > { %789 = vmatmul.mubr.msk.f32.vlgmr.msra.gmra.mrb[0].mxu0 %vm394_vm0, %v382_v12  ;;  %800 = vmatmul.mubr.msk.f32.vlgmr.msra.gmra.mrb[0].mxu1 %vm394_vm0, %v389_v13 }
  0x93   : > { %p1009_p10 = por %p1008_p4, %p1007_p13 }
  0x95   : > { %p1010_p2 = pnand %p1009_p10, %p1003_p8 }
 0x165   : > { %v790_v16 = vpop.f32.mrb[0].mxu0  ;;  %v801_v17 = vpop.f32.mrb[0].mxu1 }
 0x166   : > { %v473_v18 = vadd.f32 %v790_v16, %v393_v14  ;;  %v467_v19 = vpop.f32.mrb[1].mxu0  ;;  %v565_v20 = vadd.f32 %v801_v17, %v486_v15  ;;  %v559_v21 = vpop.f32.mrb[1].mxu1 }
 0x167   : > { %v468_v23 = vadd.f32 %v467_v19, %v393_v14  ;;  %v560_v25 = vadd.f32 %v559_v21, %v486_v15 }
 0x168   : > { %v477_v26 = vmax.f32 %v473_v18, 0.0  ;;  %v569_v27 = vmax.f32 %v565_v20, 0.0 }
 0x169   : > { %v476_v29 = vmax.f32 %v468_v23, 0.0  ;;  %v568_v30 = vmax.f32 %v560_v25, 0.0 }
 0x16a   : > { %v480_v31 = vmul.f32 %v478_v22, %v477_v26  ;;  %v572_v32 = vmul.f32 %v570_v24, %v569_v27 }
 0x16b   : > { %v479_v33 = vmul.f32 %v478_v22, %v476_v29  ;;  %v571_v34 = vmul.f32 %v570_v24, %v568_v30 }
 0x16c   : > { %v483_v35 = vadd.f32 %v481_v28, %v480_v31 }
 0x16d   : > { %v482_v36 = vadd.f32 %v481_v28, %v479_v33 }
 0x16e   : > { %v574_v37 = vadd.f32 %v572_v32, %v483_v35 }
 0x16f   : > { %v573_v38 = vadd.f32 %v571_v34, %v482_v36 }
 0x170   : > { %v576_v39 = vmax.f32 %v574_v37, 0.0 }
 0x171   : > { %v575_v40 = vmax.f32 %v573_v38, 0.0 }
 0x172   : > { %578 = vst [vmem:[%s367_s16 + $0x8] sm:$0xff] %v576_v39 }
 0x173   : > { %577 = vst [vmem:[%s367_s16] sm:$0xff] %v575_v40 }
 0x174   : > { %1013 = shalt.err (!%p1010_p2)
}
 0x175   : > { %s1014_s12 = scalar_lea.hbm %s1367_s0, 256  ;;  %s1018_s7 = scalar_lea.hbm %s1424_s6, 512 }
 0x176   : > { %p1015_p5 = scmp.ne.s32.totalorder %s1367_s0, %s1014_s12  ;;  %p1019_p12 = scmp.lt.u32.totalorder %s1367_s0, %s1424_s6 }
 0x177   : > { %p1020_p0 = scmp.lt.u32.totalorder %s1018_s7, %s1014_s12  ;;  %p1022_p11 = scmp.lt.u32.totalorder %s1014_s12, %s1367_s0 }
 0x178   : > { %p1016_p1 = pnand %p1015_p5, %p1451_p7 }
 0x179   : > { %p1021_p9 = por %p1020_p0, %p1019_p12 }
 0x17a   : > { %p1017_p6 = pneg %p1016_p1 }
 0x17b   : > { %p1023_p3 = por %p1022_p11, %p1021_p9 }
 0x17d   : > { %p1024_p8 = pnand %p1023_p3, %p1017_p6 }
 0x17f   : > { %1027 = shalt.err (!%p1024_p8)
}
 0x180   : > { %s1103_s30 = smov 128   ;;  %s1104_s17 = smov 8  }
 0x181   : > { %830 = dma.vmem_to_hbm [thread:$0]  (%p1451_p7), %s1369_s20, 256, %s1367_s0, %s580_s26, %s1103_s30, %s1103_s30, %s1104_s17  }
 0x182 PF: > { %s611_s21 = sand.u32 1, %s1074_s23   ;;  %p1452_p13 = scmp.ne.s32.totalorder %s1439_s11, 0 }
 0x183   : > { %p1453_p4 = scmp.ge.s32.totalorder %s1094_s28, 2  ;;  %s612_s16 = scalar_lea.sflag [#allocation5], %s611_s21 }
 0x185   : > { %p847_p10 = pnand %p1453_p4, %p1452_p13 }
 0x187   : > { %1069 = dma.done.wait (!%p847_p10), %s612_s16, 256  }
 0x188   : > { %1071 = vsyncadd (!%p847_p10), %s612_s16, 4294967040  ;;  %s28_s28 = sadd.s32 1, %s1094_s28   ;;  %s1454_s10 = sld [smem:[#allocation18_spill]] }
 0x189   : > { %p25_p2 = scmp.ge.s32.totalorder %s28_s28, 4   ;;  %s1455_s23 = smov %s1078_s24 }
 0x18a   : > { %s1456_s24 = smov %s1082_s25  ;;  %s1457_s25 = smov %s1257_s5 }
 0x18b   : > { %s1458_s26 = smov %s1090_s27  ;;  %27 = sbr.rel (!%p25_p2) target bundleno = 15 (0xf), region = 111 }
 0x18e   : > { %s1459_s27 = smov %s1454_s10 }
 0x192   :  { %617 = vsyncpa [#allocation4], 1 }
 0x193   :  { %619 = vsyncpa [#allocation4 + $0x1], 1 }
 0x194   :  { %620 = vsyncpa [#allocation8], 1 }
 0x195   :  { %622 = vsyncpa [#allocation8 + $0x1], 1 }
 0x196   :  { %623 = vsyncpa [#allocation5], 1 }
 0x197   :  { %625 = vsyncpa [#allocation5 + $0x1], 1 }
 0x198   :  { %626 = vsyncpa [#allocation6], 1 }
 0x199   :  { %628 = vsyncpa [#allocation6 + $0x1], 1 }
 0x19a   :  { %629 = vsyncpa [#allocation11], 1 }

</bundles_post_ra>
